<compile_context>
chip_gen: v7x
topology: tpu7x:2x2x1
jax: 0.10.0
libtpu: 0.0.40
codegen_flags: <defaults>
</compile_context>

<pallas_src>
import functools
import math
from typing import NamedTuple

import jax
import jax.numpy as jnp
from jax.experimental import pallas as pl
from jax.experimental.pallas import tpu as pltpu


def _round_up(x, m):
    return ((x + m - 1) // m) * m


def _sublane_multiple(dtype):
    # Native second-minor tiling: 8 for f32, 16 for bf16, 32 for int8/fp8.
    return max(8, 32 // jnp.dtype(dtype).itemsize)


def _vmem_capacity_bytes():
    try:
        cap = int(pltpu.get_tpu_info().vmem_capacity_bytes)
        if cap > 0:
            return cap
    except Exception:
        pass
    return 64 * 1024 * 1024  # conservative (v7x per-TC VMEM)


# ----------------------------------------------------------------------------
# Kernels
# ----------------------------------------------------------------------------
def _fc_kernel_f32_out(x_ref, w_ref, b_ref, o_ref, *, apply_relu):
    """Output dtype is f32: accumulate directly into the resident output tile
    (its block index is constant over k).  Saves the acc scratch and a
    full-tile copy in the epilogue."""
    k = pl.program_id(2)

    @pl.when(k == 0)
    def _():
        # Seed with the broadcast bias instead of zero-filling.
        o_ref[...] = jnp.broadcast_to(b_ref[...], o_ref.shape)

    o_ref[...] += jnp.dot(x_ref[...], w_ref[...],
                          preferred_element_type=jnp.float32)

    if apply_relu:
        @pl.when(k == pl.num_programs(2) - 1)
        def _():
            o_ref[...] = jnp.maximum(o_ref[...], 0.0)


def _fc_kernel_acc_scratch(x_ref, w_ref, b_ref, o_ref, acc_ref, *, apply_relu):
    """Generic path (non-f32 output): f32 VMEM accumulator, cast once at the
    end of the k loop."""
    k = pl.program_id(2)

    @pl.when(k == 0)
    def _():
        acc_ref[...] = jnp.broadcast_to(b_ref[...], acc_ref.shape)

    acc_ref[...] += jnp.dot(x_ref[...], w_ref[...],
                            preferred_element_type=jnp.float32)

    @pl.when(k == pl.num_programs(2) - 1)
    def _():
        out = acc_ref[...]
        if apply_relu:
            out = jnp.maximum(out, 0.0)
        o_ref[...] = out.astype(o_ref.dtype)


# ----------------------------------------------------------------------------
# Parameter preparation (hoisted out of the per-call forward path)
# ----------------------------------------------------------------------------
class FCParams(NamedTuple):
    w_t: jax.Array        # (Kp, Np), padded, compute dtype
    b: jax.Array          # (1, Np), padded, f32
    in_features: int
    out_features: int
    compute_dtype: jnp.dtype
    tile_n: int
    tile_k: int


def prepare_fc_params(w_t, b, *, compute_dtype=jnp.bfloat16,
                      tile_n=None, tile_k=None):
    """Pad / cast the weight & bias ONCE so the forward path never re-pads or
    re-casts them.  w_t: (in, out), b: (out,) or (1, out)."""
    K, N = w_t.shape
    b = jnp.reshape(b, (1, N))
    compute_dtype = jnp.dtype(compute_dtype)
    itemsize = compute_dtype.itemsize

    Kp128, Np128 = _round_up(K, 128), _round_up(N, 128)
    cap = _vmem_capacity_bytes()
    weight_budget = cap // 3  # ~21 MiB on v7x, ~42 MiB on v5e/v6e

    if tile_n is None and tile_k is None and Kp128 * Np128 * itemsize <= weight_budget:
        # Weight-resident fast path: W block index never changes -> single DMA.
        tn, tk = Np128, Kp128
    else:
        tn = tile_n if tile_n is not None else min(512, Np128)
        tk = tile_k if tile_k is not None else min(
            2048 if itemsize <= 2 else 1024, Kp128)
    assert tn % 128 == 0 and tk % 128 == 0, \
        "tile_n / tile_k must be multiples of 128"

    Kp, Np = _round_up(K, tk), _round_up(N, tn)
    w_t = w_t.astype(compute_dtype)
    if (Kp, Np) != (K, N):
        w_t = jnp.pad(w_t, ((0, Kp - K), (0, Np - N)))
    if Np != N:
        b = jnp.pad(b, ((0, 0), (0, Np - N)))
    b = b.astype(jnp.float32)

    return FCParams(w_t=w_t, b=b, in_features=K, out_features=N,
                    compute_dtype=compute_dtype, tile_n=tn, tile_k=tk)


def init_fully_connected_params(key, in_features, out_features, *,
                                param_dtype=jnp.float32,
                                compute_dtype=jnp.bfloat16,
                                tile_n=None, tile_k=None):
    """Re-implementation of _init_weights: xavier_uniform_ on the (out, in)
    weight, zeros on the bias — then pre-padded/cast for the kernel."""
    bound = math.sqrt(6.0 / (in_features + out_features))
    w = jax.random.uniform(key, (out_features, in_features), dtype=param_dtype,
                           minval=-bound, maxval=bound)
    b = jnp.zeros((out_features,), dtype=param_dtype)
    return prepare_fc_params(w.T, b, compute_dtype=compute_dtype,
                             tile_n=tile_n, tile_k=tile_k)


# ----------------------------------------------------------------------------
# Forward
# ----------------------------------------------------------------------------
def fully_connected(x, params: FCParams, *, apply_relu=True, tile_m=None):
    """out = activation(x @ W + b).  x: (B, in_features) -> (B, out_features)."""
    M, K = x.shape
    assert K == params.in_features, (K, params.in_features)
    Kp, Np = params.w_t.shape
    N = params.out_features
    tn, tk = params.tile_n, params.tile_k
    cdt = params.compute_dtype
    out_dtype = jnp.dtype(x.dtype)

    x = x.astype(cdt)
    sub = _sublane_multiple(cdt)

    if tile_m is not None:
        assert tile_m % sub == 0, f"tile_m must be a multiple of {sub} for {cdt}"
        tm = tile_m
    else:
        tm = min(512, _round_up(M, sub))
        # Megacore occupancy (v7x has 2 TCs): prefer >= 2 parallel output blocks.
        if (Np // tn) * pl.cdiv(M, tm) < 2:
            half = _round_up(max(tm // 2, sub), sub)
            if half < tm and pl.cdiv(M, half) >= 2:
                tm = half

    # VMEM budget: double-buffered x/w/b tiles + output tile (+ f32 acc scratch
    # for non-f32 outputs), clamped to the physical VMEM of this chip.
    cap = _vmem_capacity_bytes()
    in_isz = cdt.itemsize
    out_isz = out_dtype.itemsize
    use_scratch = out_dtype != jnp.float32

    def _need(tm_):
        n = 2 * (tm_ * tk + tk * tn) * in_isz   # x / w tiles, double-buffered
        n += 2 * tn * 4                          # f32 bias tile
        n += 2 * tm_ * tn * out_isz              # output tile
        if use_scratch:
            n += tm_ * tn * 4                    # f32 accumulator
        return n

    budget = int(0.7 * cap)
    while _need(tm) > budget and tm > sub:
        tm = max(sub, _round_up(tm // 2, sub))

    Mp = _round_up(M, tm)
    if (Mp, Kp) != (M, K):
        x = jnp.pad(x, ((0, Mp - M), (0, Kp - K)))

    grid = (Mp // tm, Np // tn, Kp // tk)
    vmem_limit = int(min(max(int(1.5 * _need(tm)), 16 * 1024 * 1024),
                         cap - 2 * 1024 * 1024))

    if use_scratch:
        kernel = functools.partial(_fc_kernel_acc_scratch, apply_relu=apply_relu)
        scratch = [pltpu.VMEM((tm, tn), jnp.float32)]
    else:
        kernel = functools.partial(_fc_kernel_f32_out, apply_relu=apply_relu)
        scratch = []

    out_p = pl.pallas_call(
        kernel,
        out_shape=jax.ShapeDtypeStruct((Mp, Np), out_dtype),
        grid_spec=pltpu.PrefetchScalarGridSpec(
            num_scalar_prefetch=0,
            grid=grid,
            in_specs=[
                pl.BlockSpec((tm, tk), lambda i, j, k: (i, k)),
                pl.BlockSpec((tk, tn), lambda i, j, k: (k, j)),
                pl.BlockSpec((1, tn), lambda i, j, k: (0, j)),
            ],
            out_specs=pl.BlockSpec((tm, tn), lambda i, j, k: (i, j)),
            scratch_shapes=scratch,
        ),
        compiler_params=pltpu.CompilerParams(
            dimension_semantics=("parallel", "parallel", "arbitrary"),
            vmem_limit_bytes=vmem_limit,
        ),
    )(x, params.w_t, params.b)

    if (Mp, Np) != (M, N):
        out_p = out_p[:M, :N]
    return out_p


# ----------------------------------------------------------------------------
# Self-test
# ----------------------------------------------------------------------------
if __name__ == "__main__":
    key = jax.random.PRNGKey(0)
    k_x1, k_w1, k_x2, k_w2, k_x3 = jax.random.split(key, 5)

    # --- Check 1: module demo shapes, default bf16-MXU / f32-accumulate path.
    #     Weight-resident fast path, grid (1,1,1), padded lane-dense tiles.
    batch, fin, fout = 8, 32, 64
    x1 = jax.random.normal(k_x1, (batch, fin), dtype=jnp.float32)
    params1 = init_fully_connected_params(k_w1, fin, fout)  # bf16 compute default
    out1 = jax.block_until_ready(fully_connected(x1, params1, apply_relu=True))

    w1_f32 = params1.w_t[:fin, :fout].astype(jnp.float32)   # bf16-rounded weight
    x1_b = x1.astype(jnp.bfloat16).astype(jnp.float32)        # same input rounding
    ref1 = jnp.maximum(x1_b @ w1_f32 + params1.b[:, :fout], 0.0)
    assert out1.shape == (batch, fout)
    assert out1.dtype == x1.dtype
    assert jnp.allclose(out1, ref1, atol=2e-3, rtol=2e-3)

    # --- Check 2: multi-tile grid (2,2,2), explicit f32 operands, accumulation
    #     directly into the resident f32 output tile (no acc scratch).
    M2, K2, N2 = 128, 256, 256
    x2 = jax.random.normal(k_x2, (M2, K2), dtype=jnp.float32)
    params2 = init_fully_connected_params(
        k_w2, K2, N2, compute_dtype=jnp.float32, tile_n=128, tile_k=128)
    out2 = jax.block_until_ready(
        fully_connected(x2, params2, apply_relu=True, tile_m=64))
    w2 = params2.w_t[:K2, :N2]
    ref2 = jnp.maximum(x2 @ w2 + params2.b[:, :N2], 0.0)
    assert out2.shape == (M2, N2)
    assert jnp.allclose(out2, ref2, atol=2e-3, rtol=2e-3)

    # --- Check 3: bf16 input/output (exercises the f32-acc-scratch kernel).
    x3 = jax.random.normal(k_x3, (16, fin), dtype=jnp.bfloat16)
    out3 = jax.block_until_ready(fully_connected(x3, params1, apply_relu=True))
    ref3 = jnp.maximum(
        x3.astype(jnp.float32) @ w1_f32 + params1.b[:, :fout], 0.0)
    assert out3.shape == (16, fout) and out3.dtype == jnp.bfloat16
    assert jnp.allclose(out3.astype(jnp.float32), ref3, atol=3e-2, rtol=3e-2)

    print("KERNEL_OK")
</pallas_src>

<mosaic_0001>
module attributes {stable_mosaic.version = 11 : i64} {
  func.func @_fc_kernel_f32_out(%arg0: i32, %arg1: i32, %arg2: i32, %arg3: memref<16x128xbf16, #tpu.memory_space<vmem>>, %arg4: memref<128x128xbf16, #tpu.memory_space<vmem>>, %arg5: memref<1x128xf32, #tpu.memory_space<vmem>>, %arg6: memref<16x128xf32, #tpu.memory_space<vmem>>) attributes {dimension_semantics = [#tpu.dimension_semantics<parallel>, #tpu.dimension_semantics<parallel>, #tpu.dimension_semantics<arbitrary>], iteration_bounds = array<i64: 1, 1, 1>, scalar_prefetch = 0 : i64, scratch_operands = 0 : i64, tpu.core_type = #tpu.core_type<tc>, window_params = [{transform_indices = @transform_0, window_bounds = array<i64: 16, 128>}, {transform_indices = @transform_1, window_bounds = array<i64: 128, 128>}, {transform_indices = @transform_2, window_bounds = array<i64: 1, 128>}, {transform_indices = @transform_3, window_bounds = array<i64: 16, 128>}]} {
    %c0_i32 = arith.constant 0 : i32
    %0 = arith.cmpi eq, %arg2, %c0_i32 : i32
    %1 = arith.extui %0 : i1 to i32
    %c0_i32_0 = arith.constant 0 : i32
    %2 = arith.cmpi ne, %1, %c0_i32_0 : i32
    scf.if %2 {
      %c0_10 = arith.constant 0 : index
      %c0_11 = arith.constant 0 : index
      %12 = vector.load %arg5[%c0_10, %c0_11] : memref<1x128xf32, #tpu.memory_space<vmem>>, vector<1x128xf32>
      %13 = vector.shape_cast %12 : vector<1x128xf32> to vector<1x128xf32>
      %14 = vector.broadcast %13 : vector<1x128xf32> to vector<16x128xf32>
      %c0_12 = arith.constant 0 : index
      %c0_13 = arith.constant 0 : index
      %15 = vector.load %arg6[%c0_12, %c0_13] : memref<16x128xf32, #tpu.memory_space<vmem>>, vector<16x128xf32>
      tpu.vector_store %arg6[%c0_12, %c0_13], %14 {strides = array<i32>} : memref<16x128xf32, #tpu.memory_space<vmem>>, vector<16x128xf32>,
    } else {
    }
    %c0 = arith.constant 0 : index
    %c0_1 = arith.constant 0 : index
    %3 = vector.load %arg6[%c0, %c0_1] : memref<16x128xf32, #tpu.memory_space<vmem>>, vector<16x128xf32>
    %c0_2 = arith.constant 0 : index
    %c0_3 = arith.constant 0 : index
    %4 = vector.load %arg3[%c0_2, %c0_3] : memref<16x128xbf16, #tpu.memory_space<vmem>>, vector<16x128xbf16>
    %c0_4 = arith.constant 0 : index
    %c0_5 = arith.constant 0 : index
    %5 = vector.load %arg4[%c0_4, %c0_5] : memref<128x128xbf16, #tpu.memory_space<vmem>>, vector<128x128xbf16>
    %cst = arith.constant dense<0.000000e+00> : vector<16x128xf32>
    %6 = tpu.matmul %4, %5, %cst {dimension_numbers = #tpu.dot_dimension_numbers<[1], [0], [0], [1], [0, 0, 1, 1], [], []>} : vector<16x128xbf16>, vector<128x128xbf16>, vector<16x128xf32> -> vector<16x128xf32>
    %7 = arith.addf %3, %6 : vector<16x128xf32>
    %c0_6 = arith.constant 0 : index
    %c0_7 = arith.constant 0 : index
    %8 = vector.load %arg6[%c0_6, %c0_7] : memref<16x128xf32, #tpu.memory_space<vmem>>, vector<16x128xf32>
    tpu.vector_store %arg6[%c0_6, %c0_7], %7 {strides = array<i32>} : memref<16x128xf32, #tpu.memory_space<vmem>>, vector<16x128xf32>,
    %c0_i32_8 = arith.constant 0 : i32
    %9 = arith.cmpi eq, %arg2, %c0_i32_8 : i32
    %10 = arith.extui %9 : i1 to i32
    %c0_i32_9 = arith.constant 0 : i32
    %11 = arith.cmpi ne, %10, %c0_i32_9 : i32
    scf.if %11 {
      %c0_10 = arith.constant 0 : index
      %c0_11 = arith.constant 0 : index
      %12 = vector.load %arg6[%c0_10, %c0_11] : memref<16x128xf32, #tpu.memory_space<vmem>>, vector<16x128xf32>
      %cst_12 = arith.constant 0.000000e+00 : f32
      %13 = vector.broadcast %cst_12 : f32 to vector<16x128xf32>
      %14 = arith.maximumf %12, %13 : vector<16x128xf32>
      %c0_13 = arith.constant 0 : index
      %c0_14 = arith.constant 0 : index
      %15 = vector.load %arg6[%c0_13, %c0_14] : memref<16x128xf32, #tpu.memory_space<vmem>>, vector<16x128xf32>
      tpu.vector_store %arg6[%c0_13, %c0_14], %14 {strides = array<i32>} : memref<16x128xf32, #tpu.memory_space<vmem>>, vector<16x128xf32>,
    } else {
    }
    return
  }
  func.func @transform_0(%arg0: i32, %arg1: i32, %arg2: i32) -> (i32, i32) {
    %c0_i32 = arith.constant 0 : i32
    return %arg0, %arg2 : i32, i32
  }
  func.func @transform_1(%arg0: i32, %arg1: i32, %arg2: i32) -> (i32, i32) {
    %c0_i32 = arith.constant 0 : i32
    return %arg2, %arg1 : i32, i32
  }
  func.func @transform_2(%arg0: i32, %arg1: i32, %arg2: i32) -> (i32, i32) {
    %c0_i32 = arith.constant 0 : i32
    %c0_i32_0 = arith.constant 0 : i32
    return %c0_i32, %arg1 : i32, i32
  }
  func.func @transform_3(%arg0: i32, %arg1: i32, %arg2: i32) -> (i32, i32) {
    %c0_i32 = arith.constant 0 : i32
    return %arg0, %arg1 : i32, i32
  }
}

</mosaic_0001>

<bundles_post_ra>
// kernel: tpu_custom_call.1
= control target key start
LH: loop header
LB: loop body
LE: loop exit
PB: predicated region body
PF: predicated region fallthrough
CT: control target
= control target key end

     0   :  { %8 = vsyncpa [#allocation3], 0  ;;  %s400_s0 = inlined_call_operand.hbm [shape: bf16[16,128], index: 0, kind: input, shape index: {}]   ;;  %s401_s1 = inlined_call_operand.hbm [shape: bf16[128,128], index: 1, kind: input, shape index: {}]   ;;  %s402_s2 = inlined_call_operand.vmem [shape: f32[1,128], index: 2, kind: input, shape index: {}]   ;;  %s403_s3 = inlined_call_operand.hbm [shape: f32[16,128], index: 3, kind: output, shape index: {}]  }
   0x1   :  { %9 = vsyncpa [#allocation6], 0 }
   0x2   :  { %10 = vsyncpa [#allocation4], 0  ;;  %s332_s12 = smov [#allocation2]   ;;  %s260_s16 = scalar_lea.hbm %s400_s0, 128 }
   0x3   :  { %s16_s13 = sshll.u32 %s332_s12, 4  ;;  %p261_p0 = scmp.ne.s32.totalorder %s400_s0, %s260_s16  ;;  %s17_s13 = int_to_ptr.vmem [resolvable:$true] %s16_s13 }
   0x4   :  { %p264_p1 = scmp.lt.u32.totalorder %s260_s16, %s400_s0 }
   0x6   :  { %p266_p2 = pnand %p264_p1, %p261_p0 }
   0x8   :  { %269 = shalt.err (!%p266_p2)
}
   0x9   :  { %s270_s21 = scalar_lea.vmem %s17_s13, 128  ;;  %p275_p4 = scmp.lt.s32.totalorder %s17_s13, %s17_s13 }
   0xa   :  { %p271_p3 = scmp.ne.s32.totalorder %s17_s13, %s270_s21  ;;  %p276_p5 = scmp.lt.s32.totalorder %s270_s21, %s270_s21 }
   0xc   :  { %p277_p6 = por %p276_p5, %p275_p4 }
   0xe   :  { %p278_p7 = pnand %p277_p6, %p271_p3 }
  0x10   :  { %281 = shalt.err (!%p278_p7)
}
  0x11   :  { %s333_s22 = smov 64   ;;  %s334_s23 = smov 4  }
  0x12   :  { %22 = dma.hbm_to_vmem [thread:$0]  %s400_s0, 128, %s17_s13, [#allocation3], %s333_s22, %s333_s22, %s334_s23  }
  0x13   :  { %s335_s26 = smov [#allocation5]   ;;  %s282_s30 = scalar_lea.hbm %s401_s1, 1024 }
  0x14   :  { %s28_s27 = sshll.u32 %s335_s26, 4  ;;  %p283_p8 = scmp.ne.s32.totalorder %s401_s1, %s282_s30  ;;  %s29_s27 = int_to_ptr.vmem [resolvable:$true] %s28_s27 }
  0x15   :  { %p286_p9 = scmp.lt.u32.totalorder %s282_s30, %s401_s1 }
  0x17   :  { %p288_p10 = pnand %p286_p9, %p283_p8 }
  0x19   :  { %291 = shalt.err (!%p288_p10)
}
  0x1a   :  { %s292_s8 = scalar_lea.vmem %s29_s27, 1024  ;;  %p297_p12 = scmp.lt.s32.totalorder %s29_s27, %s29_s27 }
  0x1b   :  { %p293_p11 = scmp.ne.s32.totalorder %s29_s27, %s292_s8  ;;  %p298_p13 = scmp.lt.s32.totalorder %s292_s8, %s292_s8 }
  0x1d   :  { %p299_p0 = por %p298_p13, %p297_p12 }
  0x1f   :  { %p300_p1 = pnand %p299_p0, %p293_p11 }
  0x21   :  { %303 = shalt.err (!%p300_p1)
}
  0x22   :  { %34 = dma.hbm_to_vmem [thread:$0]  %s401_s1, 1024, %s29_s27, [#allocation6], %s333_s22, %s333_s22, %s334_s23  }
  0x23   :  { %326 = dma.done.wait [#allocation3], 128  }
  0x24   :  { %327 = vsyncadd [#allocation3], 4294967168 }
  0x25   :  { %328 = dma.done.wait [#allocation6], 1024  }
  0x26   :  { %329 = vsyncadd [#allocation6], 4294966272  ;;  %v336_v0 = vmov 0.0   ;;  %vm337_vm0 = vmmov 0   ;;  %v251_v1 = vld [vmem:[#allocation5] sm:$0xff]   ;;  %v252_v2 = vld [vmem:[#allocation5 + $0x8] sm:$0xff]  }
  0x27   :  { %222 = vmatprep.subr.bf16.mxu0 %v336_v0  ;;  %238 = vmatprep.mubr.msk.bf16.mxu0 %vm337_vm0, %v336_v0  ;;  %v253_v3 = vld [vmem:[#allocation5 + $0x10] sm:$0xff]   ;;  %v254_v4 = vld [vmem:[#allocation5 + $0x18] sm:$0xff]   ;;  %v255_v5 = vld [vmem:[#allocation5 + $0x20] sm:$0xff]   ;;  %s338_s11 = smov [#allocation7]  }
  0x28   :  { %223 = vmatpush3.bf16.msra.mxu0 %v251_v1  ;;  %v256_v6 = vld [vmem:[#allocation5 + $0x28] sm:$0xff]   ;;  %v257_v7 = vld [vmem:[#allocation5 + $0x30] sm:$0xff]   ;;  %v258_v8 = vld [vmem:[#allocation5 + $0x38] sm:$0xff]   ;;  %s190_s12 = sshll.u32 %s338_s11, 4  ;;  %s191_s12 = int_to_ptr.vmem [resolvable:$true] %s190_s12 }
  0x29   :  { %224 = vmatprep.subr.bf16.mxu0 %v336_v0  ;;  %v259_v9 = vld [vmem:[#allocation2] sm:$0xff]   ;;  %s304_s13 = scalar_lea.vmem %s191_s12, 256  ;;  %p309_p3 = scmp.lt.s32.totalorder %s191_s12, %s191_s12 }
  0x2a   :  { %v203_v10 = vld [vmem:[%s402_s2] ss:$0 sm:$0xff]  ;;  %p305_p2 = scmp.ne.s32.totalorder %s191_s12, %s304_s13  ;;  %p310_p4 = scmp.lt.s32.totalorder %s304_s13, %s304_s13 }
  0x2c   :  { %225 = vmatpush3.bf16.msra.mxu0 %v252_v2  ;;  %p311_p5 = por %p310_p4, %p309_p3 }
  0x2d   :  { %226 = vmatprep.subr.bf16.mxu0 %v336_v0 }
  0x2e   :  { %p312_p6 = pnand %p311_p5, %p305_p2 }
  0x30   :  { %227 = vmatpush3.bf16.msra.mxu0 %v253_v3 }
  0x31   :  { %228 = vmatprep.subr.bf16.mxu0 %v336_v0 }
  0x34   :  { %229 = vmatpush3.bf16.msra.mxu0 %v254_v4 }
  0x35   :  { %230 = vmatprep.subr.bf16.mxu0 %v336_v0 }
  0x38   :  { %231 = vmatpush3.bf16.msra.mxu0 %v255_v5 }
  0x39   :  { %232 = vmatprep.subr.bf16.mxu0 %v336_v0 }
  0x3c   :  { %233 = vmatpush3.bf16.msra.mxu0 %v256_v6 }
  0x3d   :  { %234 = vmatprep.subr.bf16.mxu0 %v336_v0 }
  0x40   :  { %235 = vmatpush3.bf16.msra.mxu0 %v257_v7 }
  0x41   :  { %236 = vmatprep.subr.bf16.mxu0 %v336_v0 }
  0x44   :  { %237 = vmatpush3.bf16.msra.mxu0 %v258_v8 }
  0x47   :  { %239 = vmatmul.mubr.bf16.vlgmr.msra.gmra.mrb[0].mxu0 %v259_v9 }
 0x11a   :  { %v165_v11 = vpop.f32.mrb[0].mxu0 }
 0x11b   :  { %v172_v12 = vadd.f32 %v203_v10, %v165_v11  ;;  %v240_v13 = vpop.f32.mrb[1].mxu0 }
 0x11c   :  { %v168_v14 = vpop.f32.mrb[2].mxu0 }
 0x11d   :  { %v173_v15 = vadd.f32 %v203_v10, %v168_v14  ;;  %v241_v16 = vpop.f32.mrb[3].mxu0  ;;  %v181_v17 = vmax.f32 %v172_v12, 0.0 }
 0x11f   :  { %v182_v18 = vmax.f32 %v173_v15, 0.0  ;;  %183 = vst [vmem:[#allocation7] sm:$0xff] %v181_v17 }
 0x121   :  { %184 = vst [vmem:[#allocation7 + $0x8] sm:$0xff] %v182_v18 }
 0x122   :  { %315 = shalt.err (!%p312_p6)
}
 0x123   :  { %s316_s15 = scalar_lea.hbm %s403_s3, 256 }
 0x124   :  { %p317_p7 = scmp.ne.s32.totalorder %s403_s3, %s316_s15  ;;  %p320_p8 = scmp.lt.u32.totalorder %s316_s15, %s403_s3 }
 0x126   :  { %p322_p9 = pnand %p320_p8, %p317_p7 }
 0x128   :  { %325 = shalt.err (!%p322_p9)
}
 0x129   :  { %s339_s20 = smov 128   ;;  %s340_s21 = smov 8  }
 0x12a   :  { %196 = dma.vmem_to_hbm [thread:$0]  %s191_s12, 256, %s403_s3, [#allocation4], %s339_s20, %s339_s20, %s340_s21  }
 0x12b   :  { %330 = dma.done.wait [#allocation4], 256  }
 0x12c   :  { %331 = vsyncadd [#allocation4], 4294967040 }
 0x12d   :  { %200 = vsyncpa [#allocation3], 1 }
 0x12e   :  { %201 = vsyncpa [#allocation6], 1 }
 0x12f   :  { %202 = vsyncpa [#allocation4], 1 }

</bundles_post_ra>
